<compile_context>
chip_gen: v7x
topology: tpu7x:2x2x1
jax: 0.10.0
libtpu: 0.0.40
codegen_flags: <defaults>
</compile_context>

<pallas_src>
import functools

import jax
import jax.numpy as jnp
from jax.experimental import pallas as pl
from jax.experimental.pallas import tpu as pltpu

LANES = 128
SUBLANES = 8
CHUNK_ROWS = 128          # 128x128 f32 = 16 vregs per temporary -> bounded vreg pressure
MAX_BLOCK_ROWS = 2048     # 1 MiB (f32) per input per pipeline buffer
TINY_ROWS = 256           # below this: single core, single tile, single chunk


def _dice_bce_kernel(x_ref, t_ref, acc_ref, *, n_valid_pad, tiles_per_core,
                     block_rows, chunk_rows, num_chunks, unroll, needs_mask):
    c = pl.program_id(0)   # core-split axis ("parallel")
    i = pl.program_id(1)   # streaming / reduction axis ("arbitrary")

    @pl.when(i == 0)
    def _init():
        acc_ref[...] = jnp.zeros_like(acc_ref)

    # Logical (unclamped) element offset of this block in the flat stream.
    base = (c * tiles_per_core + i) * (block_rows * LANES)

    def fold(v):
        # (chunk_rows, 128) -> (8, 128) per-lane partial sums; pure VPU adds, no XLU.
        return v.reshape(-1, SUBLANES, LANES).sum(axis=0)

    def chunk_body(k, carry):
        pt_acc, p_acc, t_acc, b_acc = carry
        r0 = pl.multiple_of(k * chunk_rows, 8)
        x = x_ref[pl.ds(r0, chunk_rows), :].astype(jnp.float32)
        t = t_ref[pl.ds(r0, chunk_rows), :].astype(jnp.float32)

        # sigmoid via tanh: one EUP push + two VPU pushes per vreg.
        p = 0.5 + 0.5 * jnp.tanh(0.5 * x)
        # Numerically-stable logits-form BCE: max(x,0) - x*t + log(1 + exp(-|x|)).
        e = jnp.exp(-jnp.abs(x))
        bce = jnp.maximum(x, 0.0) - x * t + jnp.log(1.0 + e)

        if needs_mask:
            # Only emitted (static Python branch) when the grid over-covers the
            # padded element count. Keep it a select so garbage VMEM (NaN/Inf)
            # from over-covered blocks cannot propagate.
            lin = (jax.lax.broadcasted_iota(jnp.int32, (chunk_rows, LANES), 0) * LANES
                   + jax.lax.broadcasted_iota(jnp.int32, (chunk_rows, LANES), 1))
            valid = (base + r0 * LANES + lin) < n_valid_pad
            p = jnp.where(valid, p, 0.0)
            t = jnp.where(valid, t, 0.0)
            bce = jnp.where(valid, bce, 0.0)

        return (pt_acc + fold(p * t), p_acc + fold(p),
                t_acc + fold(t), b_acc + fold(bce))

    zeros = jnp.zeros((SUBLANES, LANES), jnp.float32)
    pt_s, p_s, t_s, b_s = jax.lax.fori_loop(
        0, num_chunks, chunk_body, (zeros, zeros, zeros, zeros), unroll=unroll)

    acc_ref[0, 0] += pt_s     # intersection: sum(p * t)
    acc_ref[0, 1] += p_s      # sum(p)
    acc_ref[0, 2] += t_s      # sum(t)
    acc_ref[0, 3] += b_s      # sum(elementwise BCE)


@functools.partial(jax.jit, static_argnames=("smooth",))
def dice_bce_loss(inputs, targets, smooth=1.0):
    n = inputs.size
    x = inputs.reshape(-1)
    t = targets.reshape(-1)

    # Keep narrow streaming dtypes (bf16) as-is -- the kernel up-casts on load.
    # Cast anything else (bool/int targets, f16, f64) to f32.
    if x.dtype not in (jnp.dtype(jnp.float32), jnp.dtype(jnp.bfloat16)):
        x = x.astype(jnp.float32)
    if t.dtype not in (jnp.dtype(jnp.float32), jnp.dtype(jnp.bfloat16)):
        t = t.astype(jnp.float32)

    # Pad only to a multiple of 8*128 = 1024 elements (no-op for aligned sizes);
    # the pad zeros are corrected analytically below (no in-kernel mask needed
    # for them).
    quant = SUBLANES * LANES
    n_pad = ((n + quant - 1) // quant) * quant
    if n_pad != n:
        x = jnp.pad(x, (0, n_pad - n))
        t = jnp.pad(t, (0, n_pad - n))
    rows = n_pad // LANES                          # multiple of 8

    if rows <= TINY_ROWS:
        core_split, tiles_per_core = 1, 1
        block_rows = rows
        chunk_rows = rows
    else:
        core_split = 2                             # always feed both TCs on v7x
        chunks_total = pl.cdiv(rows, CHUNK_ROWS)
        chunks_per_core = pl.cdiv(chunks_total, core_split)
        chunks_per_tile = min(chunks_per_core, MAX_BLOCK_ROWS // CHUNK_ROWS)
        block_rows = chunks_per_tile * CHUNK_ROWS
        tiles_per_core = pl.cdiv(chunks_per_core, chunks_per_tile)
        chunk_rows = CHUNK_ROWS
    num_chunks = block_rows // chunk_rows
    unroll = min(num_chunks, 8)

    coverage_rows = core_split * tiles_per_core * block_rows
    needs_mask = coverage_rows != rows             # over-coverage beyond padded array
    num_blocks_total = pl.cdiv(rows, block_rows)   # blocks that exist in the array

    x2 = x.reshape(rows, LANES)
    t2 = t.reshape(rows, LANES)

    kernel = functools.partial(
        _dice_bce_kernel,
        n_valid_pad=n_pad,
        tiles_per_core=tiles_per_core,
        block_rows=block_rows,
        chunk_rows=chunk_rows,
        num_chunks=num_chunks,
        unroll=unroll,
        needs_mask=needs_mask,
    )

    def in_index_map(c, i):
        # Clamp so an over-covering (fully masked) block never starts past the
        # end of the array.
        return (jnp.minimum(c * tiles_per_core + i, num_blocks_total - 1), 0)

    in_spec = pl.BlockSpec((block_rows, LANES), in_index_map)
    acc_spec = pl.BlockSpec((1, 4, SUBLANES, LANES), lambda c, i: (c, 0, 0, 0))

    out_bytes = core_split * 4 * SUBLANES * LANES * 4
    cost = pl.CostEstimate(
        flops=12 * n_pad,
        transcendentals=3 * n_pad,
        bytes_accessed=int(n_pad * (x2.dtype.itemsize + t2.dtype.itemsize)) + out_bytes,
    )

    acc = pl.pallas_call(
        kernel,
        out_shape=jax.ShapeDtypeStruct((core_split, 4, SUBLANES, LANES), jnp.float32),
        grid_spec=pltpu.PrefetchScalarGridSpec(
            num_scalar_prefetch=0,
            grid=(core_split, tiles_per_core),
            in_specs=[in_spec, in_spec],
            out_specs=acc_spec,
        ),
        compiler_params=pltpu.CompilerParams(
            dimension_semantics=("parallel", "arbitrary"),
            vmem_limit_bytes=32 * 1024 * 1024,
        ),
        cost_estimate=cost,
    )(x2, t2)

    sums = jnp.sum(acc, axis=(0, 2, 3))            # (4,) tiny fused final reduction
    inter, psum, tsum, bce_sum = sums[0], sums[1], sums[2], sums[3]

    # Analytic correction for the 1024-alignment pad zeros: each contributes
    # exactly 0.5 to sum(p) and ln(2) to the BCE sum (0 to inter / sum(t)).
    n_zeros = n_pad - n
    if n_zeros:
        psum = psum - 0.5 * n_zeros
        bce_sum = bce_sum - jnp.float32(n_zeros) * jnp.log(jnp.float32(2.0))

    bce_mean = bce_sum / jnp.float32(n)
    dice_loss = 1.0 - (2.0 * inter + smooth) / (psum + tsum + smooth)
    return bce_mean + dice_loss


def _reference(inputs, targets, smooth=1.0):
    x = inputs.reshape(-1).astype(jnp.float32)
    t = targets.reshape(-1).astype(jnp.float32)
    p = jax.nn.sigmoid(x)
    inter = jnp.sum(p * t)
    dice = 1.0 - (2.0 * inter + smooth) / (jnp.sum(p) + jnp.sum(t) + smooth)
    bce = jnp.mean(jnp.maximum(x, 0.0) - x * t + jnp.log1p(jnp.exp(-jnp.abs(x))))
    return bce + dice


if __name__ == "__main__":
    key = jax.random.PRNGKey(0)
    k1, k2, k3, k4 = jax.random.split(key, 4)

    # NCHW-shaped logits / binary targets, as the PyTorch module expects.
    x = jax.random.normal(k1, (2, 4, 16, 16), dtype=jnp.float32)
    t = (jax.random.uniform(k2, (2, 4, 16, 16)) > 0.5).astype(jnp.float32)

    out = jax.block_until_ready(dice_bce_loss(x, t, smooth=1.0))
    ref = _reference(x, t, smooth=1.0)
    assert jnp.allclose(out, ref, atol=1e-5, rtol=1e-5), (out, ref)

    # Ragged size: exercises the pad + analytic-correction path.
    x2 = jax.random.normal(k3, (3, 5, 7, 11), dtype=jnp.float32)
    t2 = (jax.random.uniform(k4, (3, 5, 7, 11)) > 0.5).astype(jnp.float32)
    out2 = jax.block_until_ready(dice_bce_loss(x2, t2, smooth=1.0))
    ref2 = _reference(x2, t2, smooth=1.0)
    assert jnp.allclose(out2, ref2, atol=1e-5, rtol=1e-5), (out2, ref2)

    print("KERNEL_OK")
</pallas_src>

<mosaic_0001>
module attributes {stable_mosaic.version = 11 : i64} {
  func.func @_dice_bce_kernel(%arg0: i32, %arg1: i32, %arg2: memref<16x128xf32, #tpu.memory_space<vmem>>, %arg3: memref<16x128xf32, #tpu.memory_space<vmem>>, %arg4: memref<1x4x8x128xf32, #tpu.memory_space<vmem>>) attributes {dimension_semantics = [#tpu.dimension_semantics<parallel>, #tpu.dimension_semantics<arbitrary>], iteration_bounds = array<i64: 1, 1>, scalar_prefetch = 0 : i64, scratch_operands = 0 : i64, tpu.core_type = #tpu.core_type<tc>, window_params = [{transform_indices = @transform_0, window_bounds = array<i64: 16, 128>}, {transform_indices = @transform_1, window_bounds = array<i64: 16, 128>}, {transform_indices = @transform_2, window_bounds = array<i64: 1, 4, 8, 128>}]} {
    %c0_i32 = arith.constant 0 : i32
    %0 = arith.cmpi eq, %arg1, %c0_i32 : i32
    %1 = arith.extui %0 : i1 to i32
    %c0_i32_0 = arith.constant 0 : i32
    %2 = arith.cmpi ne, %1, %c0_i32_0 : i32
    scf.if %2 {
      %cst_42 = arith.constant 0.000000e+00 : f32
      %66 = vector.broadcast %cst_42 : f32 to vector<1x4x8x128xf32>
      %c0_43 = arith.constant 0 : index
      %c0_44 = arith.constant 0 : index
      %c0_45 = arith.constant 0 : index
      %c0_46 = arith.constant 0 : index
      %67 = vector.load %arg4[%c0_43, %c0_44, %c0_45, %c0_46] : memref<1x4x8x128xf32, #tpu.memory_space<vmem>>, vector<1x4x8x128xf32>
      tpu.vector_store %arg4[%c0_43, %c0_44, %c0_45, %c0_46], %66 {strides = array<i32>} : memref<1x4x8x128xf32, #tpu.memory_space<vmem>>, vector<1x4x8x128xf32>,
    } else {
    }
    %cst = arith.constant 0.000000e+00 : f32
    %3 = vector.broadcast %cst : f32 to vector<8x128xf32>
    %c0_i32_1 = arith.constant 0 : i32
    %c16_i32 = arith.constant 16 : i32
    %4 = arith.muli %c0_i32_1, %c16_i32 : i32
    %5 = tpu.assume_multiple %4, 8 : i32
    %6 = arith.index_cast %5 : i32 to index
    %c0 = arith.constant 0 : index
    %7 = vector.load %arg2[%6, %c0] : memref<16x128xf32, #tpu.memory_space<vmem>>, vector<16x128xf32>
    %8 = arith.index_cast %5 : i32 to index
    %c0_2 = arith.constant 0 : index
    %9 = vector.load %arg3[%8, %c0_2] : memref<16x128xf32, #tpu.memory_space<vmem>>, vector<16x128xf32>
    %cst_3 = arith.constant 5.000000e-01 : f32
    %10 = vector.broadcast %cst_3 : f32 to vector<16x128xf32>
    %11 = arith.mulf %10, %7 : vector<16x128xf32>
    %12 = math.tanh %11 : vector<16x128xf32>
    %cst_4 = arith.constant 5.000000e-01 : f32
    %13 = vector.broadcast %cst_4 : f32 to vector<16x128xf32>
    %14 = arith.mulf %13, %12 : vector<16x128xf32>
    %cst_5 = arith.constant 5.000000e-01 : f32
    %15 = vector.broadcast %cst_5 : f32 to vector<16x128xf32>
    %16 = arith.addf %15, %14 : vector<16x128xf32>
    %17 = math.absf %7 : vector<16x128xf32>
    %cst_6 = arith.constant 0.000000e+00 : f32
    %18 = vector.broadcast %cst_6 : f32 to vector<16x128xf32>
    %19 = arith.subf %18, %17 : vector<16x128xf32>
    %20 = math.exp %19 : vector<16x128xf32>
    %cst_7 = arith.constant 0.000000e+00 : f32
    %21 = vector.broadcast %cst_7 : f32 to vector<16x128xf32>
    %22 = arith.maximumf %7, %21 : vector<16x128xf32>
    %23 = arith.mulf %7, %9 : vector<16x128xf32>
    %24 = arith.subf %22, %23 : vector<16x128xf32>
    %cst_8 = arith.constant 1.000000e+00 : f32
    %25 = vector.broadcast %cst_8 : f32 to vector<16x128xf32>
    %26 = arith.addf %25, %20 : vector<16x128xf32>
    %27 = math.log %26 : vector<16x128xf32>
    %28 = arith.addf %24, %27 : vector<16x128xf32>
    %29 = arith.mulf %16, %9 : vector<16x128xf32>
    %30 = vector.shape_cast %29 : vector<16x128xf32> to vector<2x8x128xf32>
    %cst_9 = arith.constant dense<0.000000e+00> : vector<8x128xf32>
    %31 = vector.multi_reduction <add>, %30, %cst_9 [0] : vector<2x8x128xf32> to vector<8x128xf32>
    %32 = arith.addf %3, %31 : vector<8x128xf32>
    %33 = vector.shape_cast %16 : vector<16x128xf32> to vector<2x8x128xf32>
    %cst_10 = arith.constant dense<0.000000e+00> : vector<8x128xf32>
    %34 = vector.multi_reduction <add>, %33, %cst_10 [0] : vector<2x8x128xf32> to vector<8x128xf32>
    %35 = arith.addf %3, %34 : vector<8x128xf32>
    %36 = vector.shape_cast %9 : vector<16x128xf32> to vector<2x8x128xf32>
    %cst_11 = arith.constant dense<0.000000e+00> : vector<8x128xf32>
    %37 = vector.multi_reduction <add>, %36, %cst_11 [0] : vector<2x8x128xf32> to vector<8x128xf32>
    %38 = arith.addf %3, %37 : vector<8x128xf32>
    %39 = vector.shape_cast %28 : vector<16x128xf32> to vector<2x8x128xf32>
    %cst_12 = arith.constant dense<0.000000e+00> : vector<8x128xf32>
    %40 = vector.multi_reduction <add>, %39, %cst_12 [0] : vector<2x8x128xf32> to vector<8x128xf32>
    %41 = arith.addf %3, %40 : vector<8x128xf32>
    %c1_i32 = arith.constant 1 : i32
    %c0_13 = arith.constant 0 : index
    %c0_14 = arith.constant 0 : index
    %c0_15 = arith.constant 0 : index
    %c0_16 = arith.constant 0 : index
    %42 = vector.load %arg4[%c0_13, %c0_14, %c0_15, %c0_16] : memref<1x4x8x128xf32, #tpu.memory_space<vmem>>, vector<1x1x8x128xf32>
    %43 = vector.shape_cast %42 : vector<1x1x8x128xf32> to vector<8x128xf32>
    %44 = arith.addf %43, %32 : vector<8x128xf32>
    %c0_17 = arith.constant 0 : index
    %c0_18 = arith.constant 0 : index
    %c0_19 = arith.constant 0 : index
    %c0_20 = arith.constant 0 : index
    %45 = vector.load %arg4[%c0_17, %c0_18, %c0_19, %c0_20] : memref<1x4x8x128xf32, #tpu.memory_space<vmem>>, vector<1x1x8x128xf32>
    %46 = vector.shape_cast %45 : vector<1x1x8x128xf32> to vector<8x128xf32>
    %47 = vector.shape_cast %44 : vector<8x128xf32> to vector<1x1x8x128xf32>
    tpu.vector_store %arg4[%c0_17, %c0_18, %c0_19, %c0_20], %47 {strides = array<i32>} : memref<1x4x8x128xf32, #tpu.memory_space<vmem>>, vector<1x1x8x128xf32>,
    %c0_21 = arith.constant 0 : index
    %c1 = arith.constant 1 : index
    %c0_22 = arith.constant 0 : index
    %c0_23 = arith.constant 0 : index
    %48 = vector.load %arg4[%c0_21, %c1, %c0_22, %c0_23] : memref<1x4x8x128xf32, #tpu.memory_space<vmem>>, vector<1x1x8x128xf32>
    %49 = vector.shape_cast %48 : vector<1x1x8x128xf32> to vector<8x128xf32>
    %50 = arith.addf %49, %35 : vector<8x128xf32>
    %c0_24 = arith.constant 0 : index
    %c1_25 = arith.constant 1 : index
    %c0_26 = arith.constant 0 : index
    %c0_27 = arith.constant 0 : index
    %51 = vector.load %arg4[%c0_24, %c1_25, %c0_26, %c0_27] : memref<1x4x8x128xf32, #tpu.memory_space<vmem>>, vector<1x1x8x128xf32>
    %52 = vector.shape_cast %51 : vector<1x1x8x128xf32> to vector<8x128xf32>
    %53 = vector.shape_cast %50 : vector<8x128xf32> to vector<1x1x8x128xf32>
    tpu.vector_store %arg4[%c0_24, %c1_25, %c0_26, %c0_27], %53 {strides = array<i32>} : memref<1x4x8x128xf32, #tpu.memory_space<vmem>>, vector<1x1x8x128xf32>,
    %c0_28 = arith.constant 0 : index
    %c2 = arith.constant 2 : index
    %c0_29 = arith.constant 0 : index
    %c0_30 = arith.constant 0 : index
    %54 = vector.load %arg4[%c0_28, %c2, %c0_29, %c0_30] : memref<1x4x8x128xf32, #tpu.memory_space<vmem>>, vector<1x1x8x128xf32>
    %55 = vector.shape_cast %54 : vector<1x1x8x128xf32> to vector<8x128xf32>
    %56 = arith.addf %55, %38 : vector<8x128xf32>
    %c0_31 = arith.constant 0 : index
    %c2_32 = arith.constant 2 : index
    %c0_33 = arith.constant 0 : index
    %c0_34 = arith.constant 0 : index
    %57 = vector.load %arg4[%c0_31, %c2_32, %c0_33, %c0_34] : memref<1x4x8x128xf32, #tpu.memory_space<vmem>>, vector<1x1x8x128xf32>
    %58 = vector.shape_cast %57 : vector<1x1x8x128xf32> to vector<8x128xf32>
    %59 = vector.shape_cast %56 : vector<8x128xf32> to vector<1x1x8x128xf32>
    tpu.vector_store %arg4[%c0_31, %c2_32, %c0_33, %c0_34], %59 {strides = array<i32>} : memref<1x4x8x128xf32, #tpu.memory_space<vmem>>, vector<1x1x8x128xf32>,
    %c0_35 = arith.constant 0 : index
    %c3 = arith.constant 3 : index
    %c0_36 = arith.constant 0 : index
    %c0_37 = arith.constant 0 : index
    %60 = vector.load %arg4[%c0_35, %c3, %c0_36, %c0_37] : memref<1x4x8x128xf32, #tpu.memory_space<vmem>>, vector<1x1x8x128xf32>
    %61 = vector.shape_cast %60 : vector<1x1x8x128xf32> to vector<8x128xf32>
    %62 = arith.addf %61, %41 : vector<8x128xf32>
    %c0_38 = arith.constant 0 : index
    %c3_39 = arith.constant 3 : index
    %c0_40 = arith.constant 0 : index
    %c0_41 = arith.constant 0 : index
    %63 = vector.load %arg4[%c0_38, %c3_39, %c0_40, %c0_41] : memref<1x4x8x128xf32, #tpu.memory_space<vmem>>, vector<1x1x8x128xf32>
    %64 = vector.shape_cast %63 : vector<1x1x8x128xf32> to vector<8x128xf32>
    %65 = vector.shape_cast %62 : vector<8x128xf32> to vector<1x1x8x128xf32>
    tpu.vector_store %arg4[%c0_38, %c3_39, %c0_40, %c0_41], %65 {strides = array<i32>} : memref<1x4x8x128xf32, #tpu.memory_space<vmem>>, vector<1x1x8x128xf32>,
    return
  }
  func.func @transform_0(%arg0: i32, %arg1: i32) -> (i32, i32) {
    %c1_i32 = arith.constant 1 : i32
    %0 = arith.muli %arg0, %c1_i32 : i32
    %1 = arith.addi %0, %arg1 : i32
    %c0_i32 = arith.constant 0 : i32
    %2 = arith.minsi %1, %c0_i32 : i32
    %c0_i32_0 = arith.constant 0 : i32
    %c0_i32_1 = arith.constant 0 : i32
    return %2, %c0_i32_0 : i32, i32
  }
  func.func @transform_1(%arg0: i32, %arg1: i32) -> (i32, i32) {
    %c1_i32 = arith.constant 1 : i32
    %0 = arith.muli %arg0, %c1_i32 : i32
    %1 = arith.addi %0, %arg1 : i32
    %c0_i32 = arith.constant 0 : i32
    %2 = arith.minsi %1, %c0_i32 : i32
    %c0_i32_0 = arith.constant 0 : i32
    %c0_i32_1 = arith.constant 0 : i32
    return %2, %c0_i32_0 : i32, i32
  }
  func.func @transform_2(%arg0: i32, %arg1: i32) -> (i32, i32, i32, i32) {
    %c0_i32 = arith.constant 0 : i32
    %c0_i32_0 = arith.constant 0 : i32
    %c0_i32_1 = arith.constant 0 : i32
    %c0_i32_2 = arith.constant 0 : i32
    return %arg0, %c0_i32, %c0_i32_0, %c0_i32_1 : i32, i32, i32, i32
  }
}

</mosaic_0001>

<bundles_post_ra>
// kernel: dice_bce_loss.1
= control target key start
LH: loop header
LB: loop body
LE: loop exit
PB: predicated region body
PF: predicated region fallthrough
CT: control target
= control target key end

     0   :  { %s216_s0 = inlined_call_operand.vmem [shape: f32[16,128], index: 0, kind: input, shape index: {}]   ;;  %s217_s1 = inlined_call_operand.vmem [shape: f32[16,128], index: 1, kind: input, shape index: {}]   ;;  %s218_s2 = inlined_call_operand.vmem [shape: f32[1,4,8,128], index: 2, kind: output, shape index: {}]  }
   0x1   :  { %v83_v0 = vld [vmem:[%s216_s0] sm:$0xff]  ;;  %v84_v1 = vld [vmem:[%s216_s0 + $0x8] sm:$0xff] }
   0x2   :  { %v85_v2 = vld [vmem:[%s217_s1] sm:$0xff]  ;;  %v86_v3 = vld [vmem:[%s217_s1 + $0x8] sm:$0xff]  ;;  %v87_v4 = vmul.f32 0.5, %v83_v0  ;;  %v88_v5 = vmul.f32 0.5, %v84_v1  ;;  %v95_v6 = vand.u32 2147483647, %v83_v0 }
   0x3   :  { %v123_v7 = vadd.f32 %v86_v3, %v85_v2  ;;  %v96_v8 = vand.u32 2147483647, %v84_v1  ;;  %v103_v27 = vmax.f32 %v83_v0, 0.0  ;;  %v105_v28 = vmul.f32 %v85_v2, %v83_v0 }
   0x4   :  { %165 = vtanh.f32 %v87_v4  ;;  %v97_v9 = vsub.f32 0.0, %v95_v6  ;;  %v104_v29 = vmax.f32 %v84_v1, 0.0  ;;  %v106_v30 = vmul.f32 %v86_v3, %v84_v1 }
   0x5   :  { %167 = vtanh.f32 %v88_v5  ;;  %v98_v10 = vsub.f32 0.0, %v96_v8  ;;  %161 = vst [vmem:[%s218_s2 + $0x10] sm:$0xff] %v123_v7  ;;  %v107_v31 = vsub.f32 %v103_v27, %v105_v28 }
   0x6   :  { %v99_v11 = vmul.f32 1.442695, %v97_v9  ;;  %v108_v33 = vsub.f32 %v104_v29, %v106_v30 }
   0x7   :  { %v101_v12 = vmul.f32 1.442695, %v98_v10 }
   0x8   :  { %169 = vpow2.f32 %v99_v11 }
   0x9   :  { %171 = vpow2.f32 %v101_v12 }
   0xe   :  { %v166_v13 = vpop.eup %165 }
   0xf   :  { %v168_v14 = vpop.eup %167  ;;  %v91_v15 = vmul.f32 0.5, %v166_v13 }
  0x10   :  { %v92_v16 = vmul.f32 0.5, %v168_v14 }
  0x11   :  { %v93_v17 = vadd.f32 0.5, %v91_v15 }
  0x12   :  { %v170_v18 = vpop.eup %169  ;;  %v94_v19 = vadd.f32 0.5, %v92_v16 }
  0x13   :  { %v172_v20 = vpop.eup %171  ;;  %v117_v21 = vmul.f32 %v93_v17, %v85_v2  ;;  %v109_v22 = vadd.f32 1.0, %v170_v18 }
  0x14   :  { %v118_v23 = vmul.f32 %v94_v19, %v86_v3  ;;  %v121_v24 = vadd.f32 %v94_v19, %v93_v17  ;;  %v110_v25 = vadd.f32 1.0, %v172_v20 }
  0x15   :  { %173 = vlog2.f32 %v109_v22 }
  0x16   :  { %v119_v26 = vadd.f32 %v118_v23, %v117_v21  ;;  %175 = vlog2.f32 %v110_v25  ;;  %159 = vst [vmem:[%s218_s2 + $0x8] sm:$0xff] %v121_v24 }
  0x18   :  { %129 = vst [vmem:[%s218_s2] sm:$0xff] %v119_v26 }
  0x1f   :  { %v174_v32 = vpop.eup %173 }
  0x20   :  { %v176_v34 = vpop.eup %175  ;;  %v112_v35 = vmul.f32 0.6931472, %v174_v32 }
  0x21   :  { %v114_v36 = vmul.f32 0.6931472, %v176_v34 }
  0x22   :  { %v115_v37 = vadd.f32 %v112_v35, %v107_v31 }
  0x23   :  { %v116_v38 = vadd.f32 %v114_v36, %v108_v33 }
  0x25   :  { %v125_v39 = vadd.f32 %v116_v38, %v115_v37 }
  0x27   :  { %163 = vst [vmem:[%s218_s2 + $0x18] sm:$0xff] %v125_v39 }

</bundles_post_ra>
